<compile_context>
chip_gen: v7x
topology: tpu7x:2x2x1
jax: 0.10.0
libtpu: 0.0.40
codegen_flags: <defaults>
</compile_context>

<pallas_src>
import jax
import jax.numpy as jnp
from jax import lax
from jax.experimental import pallas as pl
from jax.experimental.pallas import tpu as pltpu


def _round_up(v, m):
    return ((v + m - 1) // m) * m


# ---------------------------------------------------------------------------
# MXU kernels.
# ---------------------------------------------------------------------------
def _linear_single_k_kernel(x_ref, w_ref, b_ref, o_ref):
    # x_ref: (tm, K)  w_ref: (tn, K)  b_ref: (1, tn)  o_ref: (tm, tn)
    # nn.Linear contracts x's last dim against W's last dim (x @ W^T); the MXU
    # handles the transposed operand natively -> no host-side transpose.
    acc = lax.dot_general(
        x_ref[...], w_ref[...],
        dimension_numbers=(((1,), (1,)), ((), ())),
        preferred_element_type=jnp.float32,
    )
    o_ref[...] = (acc + b_ref[...]).astype(o_ref.dtype)


def _linear_multi_k_accum_out_kernel(x_ref, w_ref, b_ref, o_ref):
    # f32 output block is resident across the K axis -> accumulate in place.
    k = pl.program_id(2)

    @pl.when(k == 0)
    def _():
        o_ref[...] = jnp.broadcast_to(b_ref[...], o_ref.shape).astype(o_ref.dtype)

    o_ref[...] += lax.dot_general(
        x_ref[...], w_ref[...],
        dimension_numbers=(((1,), (1,)), ((), ())),
        preferred_element_type=jnp.float32,
    ).astype(o_ref.dtype)


def _linear_multi_k_scratch_kernel(x_ref, w_ref, b_ref, o_ref, acc_ref):
    # Non-f32 outputs: keep a f32 VMEM accumulator, cast once at the end.
    k = pl.program_id(2)

    @pl.when(k == 0)
    def _():
        acc_ref[...] = jnp.zeros_like(acc_ref)

    acc_ref[...] += lax.dot_general(
        x_ref[...], w_ref[...],
        dimension_numbers=(((1,), (1,)), ((), ())),
        preferred_element_type=jnp.float32,
    )

    @pl.when(k == pl.num_programs(2) - 1)
    def _():
        o_ref[...] = (acc_ref[...] + b_ref[...]).astype(o_ref.dtype)


def _linear_forward_mxu(x, w, b):
    n_rows, in_f = x.shape
    out_f = w.shape[0]
    itemsize = jnp.dtype(x.dtype).itemsize
    sub = 8 * (4 // itemsize)          # sublane multiple: f32 -> 8, bf16 -> 16, int8 -> 32

    # 8/128-aligned padded dims (never re-rounded up by the tile choice below).
    m_pad = _round_up(n_rows, sub)
    k_pad = _round_up(in_f, 128)
    n_pad = _round_up(out_f, 128)

    # Single jnp.pad per operand (one XLA pad op each).  Zero padding of K is
    # required for contraction correctness; padded rows/cols are sliced off.
    xp = jnp.pad(x, ((0, m_pad - n_rows), (0, k_pad - in_f)))
    wp = jnp.pad(w, ((0, n_pad - out_f), (0, k_pad - in_f)))
    bp = jnp.pad(b, (0, n_pad - out_f)).reshape(1, n_pad)

    # --- K tiling: prefer one full-K step (no accumulator, no phases).
    MAX_SINGLE_K = 2048                # 2048 f32 cols = 8 KiB per row
    if k_pad <= MAX_SINGLE_K:
        tk = k_pad
    else:
        tk = 128                       # 128 always divides k_pad
        for cand in (2048, 1024, 512, 256):
            if k_pad % cand == 0:
                tk = cand
                break
    grid_k = k_pad // tk

    # --- N tiling: 128-granule tiles that divide n_pad (out_f is tiny for LR).
    tn = 256 if (n_pad % 256 == 0) else 128
    grid_n = n_pad // tn

    # --- M tiling: big row slabs for the mem-bound regime, capped so the x
    # tile stays around <= 4 MiB (double-buffered tiles then fit v5e's 16 MiB
    # scoped default and v7x's smaller VMEM without spills).
    X_TILE_BUDGET = 4 * 1024 * 1024
    tm_budget = max(sub, (X_TILE_BUDGET // (tk * itemsize)) // sub * sub)
    tm = min(2048, m_pad, tm_budget)
    grid_m = pl.cdiv(m_pad, tm)

    # v7x megacore: give the parallel M axis >= 2 blocks when the problem allows.
    if grid_m == 1 and grid_n == 1 and m_pad >= 2 * sub:
        tm = _round_up(pl.cdiv(m_pad, 2), sub)
        grid_m = pl.cdiv(m_pad, tm)

    cost = pl.CostEstimate(
        flops=2 * m_pad * k_pad * n_pad,
        transcendentals=0,
        bytes_accessed=(xp.size + wp.size + bp.size + m_pad * n_pad) * itemsize,
    )

    if grid_k == 1:
        out_padded = pl.pallas_call(
            _linear_single_k_kernel,
            out_shape=jax.ShapeDtypeStruct((m_pad, n_pad), x.dtype),
            grid=(grid_m, grid_n),
            in_specs=[
                pl.BlockSpec((tm, k_pad), lambda i, j: (i, 0)),   # x slab (full K)
                pl.BlockSpec((tn, k_pad), lambda i, j: (j, 0)),   # W tile (out, in)
                pl.BlockSpec((1, tn), lambda i, j: (0, j)),       # bias
            ],
            out_specs=pl.BlockSpec((tm, tn), lambda i, j: (i, j)),
            compiler_params=pltpu.CompilerParams(
                dimension_semantics=("parallel", "parallel")),
            cost_estimate=cost,
        )(xp, wp, bp)
    else:
        accum_in_out = jnp.dtype(x.dtype) == jnp.float32
        kernel = (_linear_multi_k_accum_out_kernel if accum_in_out
                  else _linear_multi_k_scratch_kernel)
        scratch = [] if accum_in_out else [pltpu.VMEM((tm, tn), jnp.float32)]
        out_padded = pl.pallas_call(
            kernel,
            out_shape=jax.ShapeDtypeStruct((m_pad, n_pad), x.dtype),
            grid=(grid_m, grid_n, grid_k),
            in_specs=[
                pl.BlockSpec((tm, tk), lambda i, j, k: (i, k)),
                pl.BlockSpec((tn, tk), lambda i, j, k: (j, k)),
                pl.BlockSpec((1, tn), lambda i, j, k: (0, j)),
            ],
            out_specs=pl.BlockSpec((tm, tn), lambda i, j, k: (i, j)),
            scratch_shapes=scratch,
            compiler_params=pltpu.CompilerParams(
                dimension_semantics=("parallel", "parallel", "arbitrary")),
            cost_estimate=cost,
        )(xp, wp, bp)

    return out_padded[:n_rows, :out_f]


# ---------------------------------------------------------------------------
# Scalar path: in_features == out_features == 1 (the literal LR module shapes).
# A broadcast FMA on the VPU over a lane-dense (8k, 128) view of x.
# ---------------------------------------------------------------------------
def _linear_fma_kernel(x_ref, w_ref, b_ref, o_ref):
    # x_ref/o_ref: (rows, 128) VMEM, rows a multiple of 8 (full vregs).
    # w_ref/b_ref: (1,) f32 scalars in SMEM.
    o_ref[...] = (x_ref[...] * w_ref[0] + b_ref[0]).astype(o_ref.dtype)


def _linear_forward_scalar(x, w, b):
    n = x.shape[0]
    rows = _round_up(max(-(-n // 128), 1), 8)   # full (8,128) vreg tiles
    total = rows * 128

    xf = jnp.pad(x[:, 0], (0, total - n)).reshape(rows, 128)
    w_s = w.reshape(1).astype(jnp.float32)
    b_s = b.reshape(1).astype(jnp.float32)

    out2d = pl.pallas_call(
        _linear_fma_kernel,
        out_shape=jax.ShapeDtypeStruct((rows, 128), x.dtype),
        in_specs=[
            pl.BlockSpec(memory_space=pltpu.MemorySpace.VMEM),
            pl.BlockSpec(memory_space=pltpu.MemorySpace.SMEM),
            pl.BlockSpec(memory_space=pltpu.MemorySpace.SMEM),
        ],
        out_specs=pl.BlockSpec(memory_space=pltpu.MemorySpace.VMEM),
    )(xf, w_s, b_s)

    return out2d.reshape(-1)[:n].reshape(n, 1)


def linear_forward(x, w, b):
    """pred = x @ w.T + b  — matches torch.nn.Linear(in, out) semantics."""
    _, in_f = x.shape
    out_f = w.shape[0]
    if in_f == 1 and out_f == 1:
        return _linear_forward_scalar(x, w, b)
    return _linear_forward_mxu(x, w, b)


if __name__ == "__main__":
    key = jax.random.PRNGKey(0)
    kx, kw, kb, kx2, kw2, kb2, kx3, kw3, kb3 = jax.random.split(key, 9)

    # --- Case 1: the literal module — nn.Linear(1, 1), x = randn(100, 1) * 10
    input_size, output_size, n = 1, 1, 100
    x = jax.random.normal(kx, (n, input_size), dtype=jnp.float32) * 10.0
    bound = 1.0 / (input_size ** 0.5)
    w = jax.random.uniform(kw, (output_size, input_size),
                           minval=-bound, maxval=bound, dtype=jnp.float32)
    b = jax.random.uniform(kb, (output_size,),
                           minval=-bound, maxval=bound, dtype=jnp.float32)

    pred = linear_forward(x, w, b)
    jax.block_until_ready(pred)
    ref = x @ w.T + b
    assert pred.shape == (n, output_size)
    assert jnp.allclose(pred, ref, atol=1e-5, rtol=1e-5)

    # --- Case 2: single-K MXU path (padding, M split, grid=(2,1)).
    in2, out2, n2 = 300, 5, 100
    x2 = jnp.round(jax.random.normal(kx2, (n2, in2)) * 2.0).astype(jnp.float32)
    w2 = jnp.round(jax.random.normal(kw2, (out2, in2)) * 2.0).astype(jnp.float32)
    b2 = jax.random.normal(kb2, (out2,), dtype=jnp.float32)

    pred2 = linear_forward(x2, w2, b2)
    jax.block_until_ready(pred2)
    ref2 = x2 @ w2.T + b2
    assert pred2.shape == (n2, out2)
    assert jnp.allclose(pred2, ref2, atol=1e-3, rtol=1e-3)

    # --- Case 3: multi-K fallback (K > 2048) accumulating into the f32 output.
    in3, out3, n3 = 2304, 3, 64
    x3 = jnp.round(jax.random.normal(kx3, (n3, in3)) * 2.0).astype(jnp.float32)
    w3 = jnp.round(jax.random.normal(kw3, (out3, in3)) * 2.0).astype(jnp.float32)
    b3 = jax.random.normal(kb3, (out3,), dtype=jnp.float32)

    pred3 = linear_forward(x3, w3, b3)
    jax.block_until_ready(pred3)
    ref3 = x3 @ w3.T + b3
    assert pred3.shape == (n3, out3)
    assert jnp.allclose(pred3, ref3, atol=1e-3, rtol=1e-3)

    print("KERNEL_OK")
</pallas_src>

<mosaic_0001>
module attributes {stable_mosaic.version = 11 : i64} {
  func.func @_linear_fma_kernel(%arg0: memref<8x128xf32, #tpu.memory_space<vmem>>, %arg1: memref<1xf32, #tpu.memory_space<smem>>, %arg2: memref<1xf32, #tpu.memory_space<smem>>, %arg3: memref<8x128xf32, #tpu.memory_space<vmem>>) attributes {dimension_semantics = [], scalar_prefetch = 0 : i64, scratch_operands = 0 : i64, tpu.core_type = #tpu.core_type<tc>} {
    %c0 = arith.constant 0 : index
    %c0_0 = arith.constant 0 : index
    %0 = vector.load %arg0[%c0, %c0_0] : memref<8x128xf32, #tpu.memory_space<vmem>>, vector<8x128xf32>
    %c0_1 = arith.constant 0 : index
    %1 = memref.load %arg1[%c0_1] : memref<1xf32, #tpu.memory_space<smem>>
    %2 = vector.broadcast %1 : f32 to vector<8x128xf32>
    %3 = arith.mulf %0, %2 : vector<8x128xf32>
    %c0_2 = arith.constant 0 : index
    %4 = memref.load %arg2[%c0_2] : memref<1xf32, #tpu.memory_space<smem>>
    %5 = vector.broadcast %4 : f32 to vector<8x128xf32>
    %6 = arith.addf %3, %5 : vector<8x128xf32>
    %c0_3 = arith.constant 0 : index
    %c0_4 = arith.constant 0 : index
    %7 = vector.load %arg3[%c0_3, %c0_4] : memref<8x128xf32, #tpu.memory_space<vmem>>, vector<8x128xf32>
    tpu.vector_store %arg3[%c0_3, %c0_4], %6 {strides = array<i32>} : memref<8x128xf32, #tpu.memory_space<vmem>>, vector<8x128xf32>,
    return
  }
}

</mosaic_0001>

<bundles_post_ra>
// kernel: tpu_custom_call.1
= control target key start
LH: loop header
LB: loop body
LE: loop exit
PB: predicated region body
PF: predicated region fallthrough
CT: control target
= control target key end

     0   :  { %10 = vsyncpa [#allocation5], 0  ;;  %s154_s0 = inlined_call_operand.hbm [shape: f32[8,128], index: 0, kind: input, shape index: {}]   ;;  %s155_s1 = inlined_call_operand.<no memory space> [shape: f32[1], index: 1, kind: input, shape index: {}]   ;;  %s156_s2 = inlined_call_operand.<no memory space> [shape: f32[1], index: 2, kind: input, shape index: {}]   ;;  %s157_s3 = inlined_call_operand.hbm [shape: f32[8,128], index: 3, kind: output, shape index: {}]  }
   0x1   :  { %11 = vsyncpa [#allocation6], 0  ;;  %s102_s12 = smov [#allocation4]   ;;  %s54_s16 = scalar_lea.hbm %s154_s0, 128 }
   0x2   :  { %s18_s13 = sshll.u32 %s102_s12, 4  ;;  %p55_p0 = scmp.ne.s32.totalorder %s154_s0, %s54_s16  ;;  %s19_s13 = int_to_ptr.vmem [resolvable:$true] %s18_s13 }
   0x3   :  { %p58_p1 = scmp.lt.u32.totalorder %s54_s16, %s154_s0 }
   0x5   :  { %p60_p2 = pnand %p58_p1, %p55_p0 }
   0x7   :  { %63 = shalt.err (!%p60_p2)
}
   0x8   :  { %s64_s21 = scalar_lea.vmem %s19_s13, 128  ;;  %p69_p4 = scmp.lt.s32.totalorder %s19_s13, %s19_s13 }
   0x9   :  { %p65_p3 = scmp.ne.s32.totalorder %s19_s13, %s64_s21  ;;  %p70_p5 = scmp.lt.s32.totalorder %s64_s21, %s64_s21 }
   0xb   :  { %p71_p6 = por %p70_p5, %p69_p4 }
   0xd   :  { %p72_p7 = pnand %p71_p6, %p65_p3 }
   0xf   :  { %75 = shalt.err (!%p72_p7)
}
  0x10   :  { %21 = dma.hbm_to_vmem [thread:$0]  %s154_s0, 128, %s19_s13, [#allocation5]  }
  0x11   :  { %98 = dma.done.wait [#allocation5], 128  }
  0x12   :  { %99 = vsyncadd [#allocation5], 4294967168  ;;  %v31_v0 = vstv %s155_s1  ;;  %v29_v1 = vld [vmem:[#allocation4] sm:$0xff]  ;;  %v34_v2 = vstv %s156_s2  ;;  %s103_s28 = smov [#allocation7]  }
  0x13   :  { %s43_s29 = sshll.u32 %s103_s28, 4  ;;  %v32_v3 = vmul.f32 %v31_v0, %v29_v1  ;;  %s44_s29 = int_to_ptr.vmem [resolvable:$true] %s43_s29 }
  0x14   :  { %s76_s30 = scalar_lea.vmem %s44_s29, 128  ;;  %p81_p9 = scmp.lt.s32.totalorder %s44_s29, %s44_s29 }
  0x15   :  { %v35_v4 = vadd.f32 %v34_v2, %v32_v3  ;;  %p77_p8 = scmp.ne.s32.totalorder %s44_s29, %s76_s30  ;;  %p82_p10 = scmp.lt.s32.totalorder %s76_s30, %s76_s30 }
  0x17   :  { %36 = vst [vmem:[#allocation7] sm:$0xff] %v35_v4  ;;  %p83_p11 = por %p82_p10, %p81_p9 }
  0x19   :  { %p84_p12 = pnand %p83_p11, %p77_p8 }
  0x1b   :  { %87 = shalt.err (!%p84_p12)
}
  0x1c   :  { %s88_s4 = scalar_lea.hbm %s157_s3, 128 }
  0x1d   :  { %p89_p13 = scmp.ne.s32.totalorder %s157_s3, %s88_s4  ;;  %p92_p0 = scmp.lt.u32.totalorder %s88_s4, %s157_s3 }
  0x1f   :  { %p94_p1 = pnand %p92_p0, %p89_p13 }
  0x21   :  { %97 = shalt.err (!%p94_p1)
}
  0x22   :  { %46 = dma.vmem_to_hbm [thread:$0]  %s44_s29, 128, %s157_s3, [#allocation6]  }
  0x23   :  { %100 = dma.done.wait [#allocation6], 128  }
  0x24   :  { %101 = vsyncadd [#allocation6], 4294967168 }
  0x25   :  { %50 = vsyncpa [#allocation5], 1 }
  0x26   :  { %51 = vsyncpa [#allocation6], 1 }

</bundles_post_ra>
